<compile_context>
chip_gen: v7x
topology: tpu7x:2x2x1
jax: 0.10.0
libtpu: 0.0.40
codegen_flags: <defaults>
</compile_context>

<pallas_src>
import functools

import jax
import jax.numpy as jnp
from jax.experimental import pallas as pl
from jax.experimental.pallas import tpu as pltpu


def _round_up(v, m):
    return (v + m - 1) // m * m


def _full_spec(shape):
    nd = len(shape)
    return pl.BlockSpec(shape, lambda i, _nd=nd: (0,) * _nd)


def gnn_layer_kernel(xe_ref, wbig_ref, vj_ref, adj_ref,
                     bias_ref, gamma_ref, beta_ref,
                     out_ref, attn_ref, *, n_real, ai_col):
    xe = xe_ref[...]                                                    # (NP, KP)

    # --- GraphLayer (heads=1, concat=False) ---------------------------------
    # Fused projection + target-side score: one MXU pass.
    #   cols [0:Cout]  -> h = x @ W
    #   col  ai_col    -> a_i = <h, att_i> + <emb, att_em_i>
    h_aug = jnp.dot(xe, wbig_ref[...], preferred_element_type=jnp.float32)  # (NP, CP)
    a_i = h_aug[:, ai_col:ai_col + 1]                                   # (NP, 1)

    # Source-side score directly in row layout: a_j[j] = <xe[j], v_j>.   (1, NP)
    a_j = jax.lax.dot_general(vj_ref[...], xe, (((1,), (1,)), ((), ())),
                              preferred_element_type=jnp.float32)

    # Edge logit for (source j -> target i) + LeakyReLU(0.2).
    logits = a_i + a_j                                                  # (NP, NP)
    logits = jnp.where(logits > 0, logits, 0.2 * logits)

    # Softmax over sources j (rows = targets), masked by adjacency.  Every row
    # (including padded ones) carries a self-loop, so denom > 0 always.
    masked = jnp.where(adj_ref[...] > 0.5, logits, jnp.float32(-1e30))
    m = jnp.max(masked, axis=-1, keepdims=True)
    p = jnp.exp(masked - m)                  # masked entries underflow to 0
    denom = jnp.sum(p, axis=-1, keepdims=True)
    attn = p * pl.reciprocal(denom, approx=True)
    attn_ref[...] = attn

    # Aggregate messages: out[i] = sum_j attn[i, j] * h[j]  (+ bias)     [MXU]
    # Extra columns of h_aug only pollute padded output columns, which the
    # zero-padded gamma/beta null out and the wrapper slices away.
    agg = jnp.dot(attn, h_aug, preferred_element_type=jnp.float32) + bias_ref[...]

    # --- BatchNorm1d (training mode, stats over the n_real real rows) -------
    row_ids = jax.lax.broadcasted_iota(jnp.int32, (agg.shape[0], 1), 0)
    rmask = (row_ids < n_real).astype(jnp.float32)
    inv_n = jnp.float32(1.0 / n_real)
    mu = jnp.sum(agg * rmask, axis=0, keepdims=True) * inv_n
    diff = (agg - mu) * rmask
    var = jnp.sum(diff * diff, axis=0, keepdims=True) * inv_n
    y = (agg - mu) * jax.lax.rsqrt(var + 1e-5) * gamma_ref[...] + beta_ref[...]

    # --- ReLU ----------------------------------------------------------------
    out_ref[...] = jnp.maximum(y, 0.0)


def gnn_layer_forward(x, adj, emb, params):
    """x:(N,Cin), adj:(N,N) dense mask (adj[target,source]=1, self loops
    included), emb:(N,Cout).  Returns (out:(N,Cout), attn:(N,N))."""
    N, cin = x.shape
    cout = params["w"].shape[1]

    # Lane-dense padded sizes.
    NP = _round_up(N, 128)
    CP = _round_up(cout + 1, 128)         # +1 column holds the folded a_i score
    KE = cin + cout
    KP = _round_up(KE, 128)
    ai_col = CP - 1

    f32 = jnp.float32
    w = params["w"].astype(f32)
    att_i, att_j = params["att_i"].astype(f32), params["att_j"].astype(f32)
    att_em_i = params["att_em_i"].astype(f32)
    att_em_j = params["att_em_j"].astype(f32)

    # [x | emb], zero-padded to (NP, KP).
    xe = jnp.zeros((NP, KP), f32)
    xe = xe.at[:N, :cin].set(x.astype(f32))
    xe = xe.at[:N, cin:KE].set(emb.astype(f32))

    # Augmented projection matrix: cols [0:cout] = W (x rows only),
    # col ai_col = v_i = [W @ att_i^T ; att_em_i^T].
    v_i = jnp.concatenate([w @ att_i.T, att_em_i.T], axis=0)[:, 0]      # (KE,)
    wbig = jnp.zeros((KP, CP), f32)
    wbig = wbig.at[:cin, :cout].set(w)
    wbig = wbig.at[:KE, ai_col].set(v_i)

    # Source-side score vector as a row (1, KP).
    v_j = jnp.concatenate([w @ att_j.T, att_em_j.T], axis=0)[:, 0]      # (KE,)
    vj = jnp.zeros((1, KP), f32).at[0, :KE].set(v_j)

    # Adjacency padded; padded target rows get a self loop so the softmax
    # denominator is never zero.
    adj_p = jnp.zeros((NP, NP), f32).at[:N, :N].set(adj.astype(f32))
    pad_ids = jnp.arange(N, NP)
    adj_p = adj_p.at[pad_ids, pad_ids].set(1.0)

    def pad_row(v):                        # (1, cout) -> (1, CP)
        return jnp.zeros((1, CP), f32).at[:, :cout].set(v.astype(f32))

    bias_p = pad_row(params["bias"])
    gamma_p = pad_row(params["gamma"])     # zero padded cols kill garbage cols
    beta_p = pad_row(params["beta"])

    inputs = (xe, wbig, vj, adj_p, bias_p, gamma_p, beta_p)

    cost = pl.CostEstimate(
        flops=2 * NP * KP * CP + 2 * NP * KP + 2 * NP * NP * CP + 8 * NP * NP,
        transcendentals=NP * NP + NP,
        bytes_accessed=4 * (NP * KP + KP * CP + KP + NP * NP
                            + 3 * CP + NP * CP + NP * NP),
    )

    kernel = functools.partial(gnn_layer_kernel, n_real=N, ai_col=ai_col)

    out_p, attn_p = pl.pallas_call(
        kernel,
        grid=(1,),
        in_specs=[_full_spec(a.shape) for a in inputs],
        out_specs=(_full_spec((NP, CP)), _full_spec((NP, NP))),
        out_shape=(jax.ShapeDtypeStruct((NP, CP), f32),
                   jax.ShapeDtypeStruct((NP, NP), f32)),
        compiler_params=pltpu.CompilerParams(
            dimension_semantics=("arbitrary",)),
        cost_estimate=cost,
    )(*inputs)

    return out_p[:N, :cout], attn_p[:N, :N]


if __name__ == "__main__":
    N, CIN, COUT = 64, 16, 32      # node_num, in_channel, out_channel (= emb dim)
    key = jax.random.PRNGKey(0)
    ks = jax.random.split(key, 12)

    x = jax.random.normal(ks[0], (N, CIN), jnp.float32)
    emb = jax.random.normal(ks[1], (N, COUT), jnp.float32)

    # Deterministic edge_index (source row 0, target row 1): ring + long-range.
    src = jnp.arange(N, dtype=jnp.int32)
    dst = (src + 1) % N
    extra_src = jnp.arange(0, N, 8, dtype=jnp.int32)
    extra_dst = (extra_src + N // 2) % N
    edge_index = jnp.stack([jnp.concatenate([src, extra_src]),
                            jnp.concatenate([dst, extra_dst])], axis=0)

    # remove_self_loops + add_self_loops, densified: adj[target, source] = 1.
    no_self = (edge_index[0] != edge_index[1]).astype(jnp.float32)
    adj = jnp.zeros((N, N), jnp.float32)
    adj = adj.at[edge_index[1], edge_index[0]].set(no_self)
    adj = adj.at[jnp.arange(N), jnp.arange(N)].set(1.0)
    new_edge_index = jnp.concatenate(
        [edge_index, jnp.stack([jnp.arange(N, dtype=jnp.int32)] * 2)], axis=1)

    scale = 1.0 / jnp.sqrt(jnp.float32(CIN))
    params = dict(
        w=jax.random.normal(ks[2], (CIN, COUT), jnp.float32) * scale,   # lin.weight
        att_i=jax.random.normal(ks[3], (1, COUT), jnp.float32) * 0.1,
        att_j=jax.random.normal(ks[4], (1, COUT), jnp.float32) * 0.1,
        att_em_i=jax.random.normal(ks[5], (1, COUT), jnp.float32) * 0.1,
        att_em_j=jax.random.normal(ks[6], (1, COUT), jnp.float32) * 0.1,
        bias=jax.random.normal(ks[7], (1, COUT), jnp.float32) * 0.01,   # GAT bias
        gamma=1.0 + 0.1 * jax.random.normal(ks[8], (1, COUT), jnp.float32),  # bn.weight
        beta=0.1 * jax.random.normal(ks[9], (1, COUT), jnp.float32),         # bn.bias
    )

    out, attn = gnn_layer_forward(x, adj, emb, params)
    jax.block_until_ready((out, attn))

    # Mirror of `self.att_weight_1` / `self.edge_index_1` attributes (glue gather).
    att_weight_1 = attn[new_edge_index[1], new_edge_index[0]]
    jax.block_until_ready(att_weight_1)

    assert out.shape == (N, COUT) and attn.shape == (N, N)
    assert bool(jnp.all(jnp.isfinite(out)))
    assert bool(jnp.all(jnp.isfinite(attn)))
    # Attention rows are a softmax over the node's in-edges (approx reciprocal).
    row_sums = jnp.sum(attn, axis=-1)
    assert bool(jnp.all(jnp.abs(row_sums - 1.0) < 1e-2))
    print("KERNEL_OK")
</pallas_src>

<mosaic_0001>
module attributes {stable_mosaic.version = 11 : i64} {
  func.func @gnn_layer_kernel(%arg0: i32, %arg1: memref<128x128xf32, #tpu.memory_space<vmem>>, %arg2: memref<128x128xf32, #tpu.memory_space<vmem>>, %arg3: memref<1x128xf32, #tpu.memory_space<vmem>>, %arg4: memref<128x128xf32, #tpu.memory_space<vmem>>, %arg5: memref<1x128xf32, #tpu.memory_space<vmem>>, %arg6: memref<1x128xf32, #tpu.memory_space<vmem>>, %arg7: memref<1x128xf32, #tpu.memory_space<vmem>>, %arg8: memref<128x128xf32, #tpu.memory_space<vmem>>, %arg9: memref<128x128xf32, #tpu.memory_space<vmem>>) attributes {dimension_semantics = [#tpu.dimension_semantics<arbitrary>], iteration_bounds = array<i64: 1>, scalar_prefetch = 0 : i64, scratch_operands = 0 : i64, tpu.core_type = #tpu.core_type<tc>, window_params = [{pipeline_mode = #tpu.pipeline_mode<synchronous>, transform_indices = @transform_0, window_bounds = array<i64: 128, 128>}, {pipeline_mode = #tpu.pipeline_mode<synchronous>, transform_indices = @transform_1, window_bounds = array<i64: 128, 128>}, {pipeline_mode = #tpu.pipeline_mode<synchronous>, transform_indices = @transform_2, window_bounds = array<i64: 1, 128>}, {pipeline_mode = #tpu.pipeline_mode<synchronous>, transform_indices = @transform_3, window_bounds = array<i64: 128, 128>}, {pipeline_mode = #tpu.pipeline_mode<synchronous>, transform_indices = @transform_4, window_bounds = array<i64: 1, 128>}, {pipeline_mode = #tpu.pipeline_mode<synchronous>, transform_indices = @transform_5, window_bounds = array<i64: 1, 128>}, {pipeline_mode = #tpu.pipeline_mode<synchronous>, transform_indices = @transform_6, window_bounds = array<i64: 1, 128>}, {pipeline_mode = #tpu.pipeline_mode<synchronous>, transform_indices = @transform_7, window_bounds = array<i64: 128, 128>}, {pipeline_mode = #tpu.pipeline_mode<synchronous>, transform_indices = @transform_8, window_bounds = array<i64: 128, 128>}]} {
    %c0 = arith.constant 0 : index
    %c0_0 = arith.constant 0 : index
    %0 = vector.load %arg1[%c0, %c0_0] : memref<128x128xf32, #tpu.memory_space<vmem>>, vector<128x128xf32>
    %c0_1 = arith.constant 0 : index
    %c0_2 = arith.constant 0 : index
    %1 = vector.load %arg2[%c0_1, %c0_2] : memref<128x128xf32, #tpu.memory_space<vmem>>, vector<128x128xf32>
    %cst = arith.constant dense<0.000000e+00> : vector<128x128xf32>
    %2 = tpu.matmul %0, %1, %cst {dimension_numbers = #tpu.dot_dimension_numbers<[1], [0], [0], [1], [0, 0, 1, 1], [], []>} : vector<128x128xf32>, vector<128x128xf32>, vector<128x128xf32> -> vector<128x128xf32>
    %3 = vector.extract_strided_slice %2 {offsets = [0, 127], sizes = [128, 1], strides = [1, 1]} : vector<128x128xf32> to vector<128x1xf32>
    %c0_3 = arith.constant 0 : index
    %c0_4 = arith.constant 0 : index
    %4 = vector.load %arg3[%c0_3, %c0_4] : memref<1x128xf32, #tpu.memory_space<vmem>>, vector<1x128xf32>
    %cst_5 = arith.constant dense<0.000000e+00> : vector<1x128xf32>
    %5 = tpu.matmul %4, %0, %cst_5 {dimension_numbers = #tpu.dot_dimension_numbers<[1], [1], [0], [0], [0, 0, 1, 0], [], []>} : vector<1x128xf32>, vector<128x128xf32>, vector<1x128xf32> -> vector<1x128xf32>
    %6 = vector.broadcast %3 : vector<128x1xf32> to vector<128x128xf32>
    %7 = vector.broadcast %5 : vector<1x128xf32> to vector<128x128xf32>
    %8 = arith.addf %6, %7 : vector<128x128xf32>
    %cst_6 = arith.constant 0.000000e+00 : f32
    %9 = vector.broadcast %cst_6 : f32 to vector<128x128xf32>
    %10 = arith.cmpf ogt, %8, %9 : vector<128x128xf32>
    %cst_7 = arith.constant 2.000000e-01 : f32
    %11 = vector.broadcast %cst_7 : f32 to vector<128x128xf32>
    %12 = arith.mulf %11, %8 : vector<128x128xf32>
    %13 = arith.select %10, %8, %12 : vector<128x128xi1>, vector<128x128xf32>
    %c0_8 = arith.constant 0 : index
    %c0_9 = arith.constant 0 : index
    %14 = vector.load %arg4[%c0_8, %c0_9] : memref<128x128xf32, #tpu.memory_space<vmem>>, vector<128x128xf32>
    %cst_10 = arith.constant 5.000000e-01 : f32
    %15 = vector.broadcast %cst_10 : f32 to vector<128x128xf32>
    %16 = arith.cmpf ogt, %14, %15 : vector<128x128xf32>
    %cst_11 = arith.constant -1.000000e+30 : f32
    %17 = vector.broadcast %cst_11 : f32 to vector<128x128xf32>
    %18 = arith.select %16, %13, %17 : vector<128x128xi1>, vector<128x128xf32>
    %cst_12 = arith.constant dense<0xFF800000> : vector<128xf32>
    %19 = vector.multi_reduction <maximumf>, %18, %cst_12 [1] : vector<128x128xf32> to vector<128xf32>
    %20 = vector.shape_cast %19 : vector<128xf32> to vector<128x1xf32>
    %21 = vector.broadcast %20 : vector<128x1xf32> to vector<128x128xf32>
    %22 = arith.subf %18, %21 : vector<128x128xf32>
    %23 = math.exp %22 : vector<128x128xf32>
    %cst_13 = arith.constant dense<0.000000e+00> : vector<128xf32>
    %24 = vector.multi_reduction <add>, %23, %cst_13 [1] : vector<128x128xf32> to vector<128xf32>
    %25 = vector.shape_cast %24 : vector<128xf32> to vector<128x1xf32>
    %26 = tpu.reciprocal %25 {approx = true} : vector<128x1xf32> -> vector<128x1xf32>
    %27 = vector.broadcast %26 : vector<128x1xf32> to vector<128x128xf32>
    %28 = arith.mulf %23, %27 : vector<128x128xf32>
    %c0_14 = arith.constant 0 : index
    %c0_15 = arith.constant 0 : index
    %29 = vector.load %arg9[%c0_14, %c0_15] : memref<128x128xf32, #tpu.memory_space<vmem>>, vector<128x128xf32>
    tpu.vector_store %arg9[%c0_14, %c0_15], %28 {strides = array<i32>} : memref<128x128xf32, #tpu.memory_space<vmem>>, vector<128x128xf32>,
    %cst_16 = arith.constant dense<0.000000e+00> : vector<128x128xf32>
    %30 = tpu.matmul %28, %2, %cst_16 {dimension_numbers = #tpu.dot_dimension_numbers<[1], [0], [0], [1], [0, 0, 1, 1], [], []>} : vector<128x128xf32>, vector<128x128xf32>, vector<128x128xf32> -> vector<128x128xf32>
    %c0_17 = arith.constant 0 : index
    %c0_18 = arith.constant 0 : index
    %31 = vector.load %arg5[%c0_17, %c0_18] : memref<1x128xf32, #tpu.memory_space<vmem>>, vector<1x128xf32>
    %32 = vector.broadcast %31 : vector<1x128xf32> to vector<128x128xf32>
    %33 = arith.addf %30, %32 : vector<128x128xf32>
    %34 = tpu.iota {dimensions = array<i32: 0>} : vector<128x1xi32>
    %c64_i32 = arith.constant 64 : i32
    %35 = vector.broadcast %c64_i32 : i32 to vector<128x1xi32>
    %36 = arith.cmpi slt, %34, %35 : vector<128x1xi32>
    %37 = arith.extui %36 : vector<128x1xi1> to vector<128x1xi32>
    %38 = arith.sitofp %37 : vector<128x1xi32> to vector<128x1xf32>
    %39 = vector.broadcast %38 : vector<128x1xf32> to vector<128x128xf32>
    %40 = arith.mulf %33, %39 : vector<128x128xf32>
    %cst_19 = arith.constant dense<0.000000e+00> : vector<128xf32>
    %41 = vector.multi_reduction <add>, %40, %cst_19 [0] : vector<128x128xf32> to vector<128xf32>
    %42 = vector.shape_cast %41 : vector<128xf32> to vector<1x128xf32>
    %cst_20 = arith.constant 1.562500e-02 : f32
    %43 = vector.broadcast %cst_20 : f32 to vector<1x128xf32>
    %44 = arith.mulf %42, %43 : vector<1x128xf32>
    %45 = vector.broadcast %44 : vector<1x128xf32> to vector<128x128xf32>
    %46 = arith.subf %33, %45 : vector<128x128xf32>
    %47 = vector.broadcast %38 : vector<128x1xf32> to vector<128x128xf32>
    %48 = arith.mulf %46, %47 : vector<128x128xf32>
    %49 = arith.mulf %48, %48 : vector<128x128xf32>
    %cst_21 = arith.constant dense<0.000000e+00> : vector<128xf32>
    %50 = vector.multi_reduction <add>, %49, %cst_21 [0] : vector<128x128xf32> to vector<128xf32>
    %51 = vector.shape_cast %50 : vector<128xf32> to vector<1x128xf32>
    %cst_22 = arith.constant 1.562500e-02 : f32
    %52 = vector.broadcast %cst_22 : f32 to vector<1x128xf32>
    %53 = arith.mulf %51, %52 : vector<1x128xf32>
    %54 = vector.broadcast %44 : vector<1x128xf32> to vector<128x128xf32>
    %55 = arith.subf %33, %54 : vector<128x128xf32>
    %cst_23 = arith.constant 9.99999974E-6 : f32
    %56 = vector.broadcast %cst_23 : f32 to vector<1x128xf32>
    %57 = arith.addf %53, %56 : vector<1x128xf32>
    %58 = math.rsqrt %57 : vector<1x128xf32>
    %59 = vector.broadcast %58 : vector<1x128xf32> to vector<128x128xf32>
    %60 = arith.mulf %55, %59 : vector<128x128xf32>
    %c0_24 = arith.constant 0 : index
    %c0_25 = arith.constant 0 : index
    %61 = vector.load %arg6[%c0_24, %c0_25] : memref<1x128xf32, #tpu.memory_space<vmem>>, vector<1x128xf32>
    %62 = vector.broadcast %61 : vector<1x128xf32> to vector<128x128xf32>
    %63 = arith.mulf %60, %62 : vector<128x128xf32>
    %c0_26 = arith.constant 0 : index
    %c0_27 = arith.constant 0 : index
    %64 = vector.load %arg7[%c0_26, %c0_27] : memref<1x128xf32, #tpu.memory_space<vmem>>, vector<1x128xf32>
    %65 = vector.broadcast %64 : vector<1x128xf32> to vector<128x128xf32>
    %66 = arith.addf %63, %65 : vector<128x128xf32>
    %cst_28 = arith.constant 0.000000e+00 : f32
    %67 = vector.broadcast %cst_28 : f32 to vector<128x128xf32>
    %68 = arith.maximumf %66, %67 : vector<128x128xf32>
    %c0_29 = arith.constant 0 : index
    %c0_30 = arith.constant 0 : index
    %69 = vector.load %arg8[%c0_29, %c0_30] : memref<128x128xf32, #tpu.memory_space<vmem>>, vector<128x128xf32>
    tpu.vector_store %arg8[%c0_29, %c0_30], %68 {strides = array<i32>} : memref<128x128xf32, #tpu.memory_space<vmem>>, vector<128x128xf32>,
    return
  }
  func.func @transform_0(%arg0: i32) -> (i32, i32) {
    %c0_i32 = arith.constant 0 : i32
    %c0_i32_0 = arith.constant 0 : i32
    %c0_i32_1 = arith.constant 0 : i32
    return %c0_i32, %c0_i32_0 : i32, i32
  }
  func.func @transform_1(%arg0: i32) -> (i32, i32) {
    %c0_i32 = arith.constant 0 : i32
    %c0_i32_0 = arith.constant 0 : i32
    %c0_i32_1 = arith.constant 0 : i32
    return %c0_i32, %c0_i32_0 : i32, i32
  }
  func.func @transform_2(%arg0: i32) -> (i32, i32) {
    %c0_i32 = arith.constant 0 : i32
    %c0_i32_0 = arith.constant 0 : i32
    %c0_i32_1 = arith.constant 0 : i32
    return %c0_i32, %c0_i32_0 : i32, i32
  }
  func.func @transform_3(%arg0: i32) -> (i32, i32) {
    %c0_i32 = arith.constant 0 : i32
    %c0_i32_0 = arith.constant 0 : i32
    %c0_i32_1 = arith.constant 0 : i32
    return %c0_i32, %c0_i32_0 : i32, i32
  }
  func.func @transform_4(%arg0: i32) -> (i32, i32) {
    %c0_i32 = arith.constant 0 : i32
    %c0_i32_0 = arith.constant 0 : i32
    %c0_i32_1 = arith.constant 0 : i32
    return %c0_i32, %c0_i32_0 : i32, i32
  }
  func.func @transform_5(%arg0: i32) -> (i32, i32) {
    %c0_i32 = arith.constant 0 : i32
    %c0_i32_0 = arith.constant 0 : i32
    %c0_i32_1 = arith.constant 0 : i32
    return %c0_i32, %c0_i32_0 : i32, i32
  }
  func.func @transform_6(%arg0: i32) -> (i32, i32) {
    %c0_i32 = arith.constant 0 : i32
    %c0_i32_0 = arith.constant 0 : i32
    %c0_i32_1 = arith.constant 0 : i32
    return %c0_i32, %c0_i32_0 : i32, i32
  }
  func.func @transform_7(%arg0: i32) -> (i32, i32) {
    %c0_i32 = arith.constant 0 : i32
    %c0_i32_0 = arith.constant 0 : i32
    %c0_i32_1 = arith.constant 0 : i32
    return %c0_i32, %c0_i32_0 : i32, i32
  }
  func.func @transform_8(%arg0: i32) -> (i32, i32) {
    %c0_i32 = arith.constant 0 : i32
    %c0_i32_0 = arith.constant 0 : i32
    %c0_i32_1 = arith.constant 0 : i32
    return %c0_i32, %c0_i32_0 : i32, i32
  }
}

</mosaic_0001>

<bundles_post_ra>
// kernel: tpu_custom_call.1
= control target key start
LH: loop header
LB: loop body
LE: loop exit
PB: predicated region body
PF: predicated region fallthrough
CT: control target
= control target key end

     0   :  { %14 = vsyncpa [#allocation3], 0  ;;  %s2056_s0 = inlined_call_operand.hbm [shape: f32[128,128], index: 0, kind: input, shape index: {}]   ;;  %s2057_s1 = inlined_call_operand.hbm [shape: f32[128,128], index: 1, kind: input, shape index: {}]   ;;  %s2058_s2 = inlined_call_operand.vmem [shape: f32[1,128], index: 2, kind: input, shape index: {}]   ;;  %s2059_s3 = inlined_call_operand.hbm [shape: f32[128,128], index: 3, kind: input, shape index: {}]   ;;  %s2060_s4 = inlined_call_operand.vmem [shape: f32[1,128], index: 4, kind: input, shape index: {}]   ;;  %s2061_s5 = inlined_call_operand.vmem [shape: f32[1,128], index: 5, kind: input, shape index: {}]   ;;  %s2062_s6 = inlined_call_operand.vmem [shape: f32[1,128], index: 6, kind: input, shape index: {}]   ;;  %s2063_s7 = inlined_call_operand.hbm [shape: f32[128,128], index: 7, kind: output, shape index: {0}]   ;;  %s2064_s8 = inlined_call_operand.hbm [shape: f32[128,128], index: 8, kind: output, shape index: {1}]  }
   0x1   :  { %15 = vsyncpa [#allocation6], 0 }
   0x2   :  { %16 = vsyncpa [#allocation4], 0 }
   0x3   :  { %17 = vsyncpa [#allocation10], 0  ;;  %s1646_s27 = smov [#allocation5]   ;;  %s1647_s29 = smov [#allocation2]  }
   0x4   :  { %s35_s28 = sshll.u32 %s1646_s27, 4  ;;  %s23_s30 = sshll.u32 %s1647_s29, 4  ;;  %s36_s28 = int_to_ptr.vmem [resolvable:$true] %s35_s28  ;;  %s1702_s30 = int_to_ptr.vmem [resolvable:$true] %s23_s30 }
   0x5   :  { %s1528_s11 = scalar_lea.hbm %s2057_s1, 2048 }
   0x6   :  { %p1529_p0 = scmp.ne.s32.totalorder %s2057_s1, %s1528_s11  ;;  %p1532_p1 = scmp.lt.u32.totalorder %s1528_s11, %s2057_s1 }
   0x8   :  { %p1534_p2 = pnand %p1532_p1, %p1529_p0 }
   0xa   :  { %1537 = shalt.err (!%p1534_p2)
}
   0xb   :  { %s1538_s16 = scalar_lea.vmem %s36_s28, 2048  ;;  %p1543_p4 = scmp.lt.s32.totalorder %s36_s28, %s36_s28 }
   0xc   :  { %p1539_p3 = scmp.ne.s32.totalorder %s36_s28, %s1538_s16  ;;  %p1544_p5 = scmp.lt.s32.totalorder %s1538_s16, %s1538_s16 }
   0xe   :  { %p1545_p6 = por %p1544_p5, %p1543_p4 }
  0x10   :  { %p1546_p7 = pnand %p1545_p6, %p1539_p3 }
  0x12   :  { %1549 = shalt.err (!%p1546_p7)
}
  0x13   :  { %s1648_s17 = smov 128   ;;  %s1649_s18 = smov 8  }
  0x14   :  { %41 = dma.hbm_to_vmem [thread:$0]  %s2057_s1, 2048, %s36_s28, [#allocation6], %s1648_s17, %s1648_s17, %s1649_s18  }
  0x15   :  { %s1550_s23 = scalar_lea.hbm %s2056_s0, 2048 }
  0x16   :  { %p1551_p8 = scmp.ne.s32.totalorder %s2056_s0, %s1550_s23  ;;  %p1554_p9 = scmp.lt.u32.totalorder %s1550_s23, %s2056_s0 }
  0x18   :  { %p1556_p10 = pnand %p1554_p9, %p1551_p8 }
  0x1a   :  { %1559 = shalt.err (!%p1556_p10)
}
  0x1b   :  { %s1560_s29 = scalar_lea.vmem %s1702_s30, 2048  ;;  %p1565_p12 = scmp.lt.s32.totalorder %s1702_s30, %s1702_s30 }
  0x1c   :  { %p1561_p11 = scmp.ne.s32.totalorder %s1702_s30, %s1560_s29  ;;  %p1566_p13 = scmp.lt.s32.totalorder %s1560_s29, %s1560_s29 }
  0x1e   :  { %p1567_p0 = por %p1566_p13, %p1565_p12 }
  0x20   :  { %p1568_p1 = pnand %p1567_p0, %p1561_p11 }
  0x22   :  { %1571 = shalt.err (!%p1568_p1)
}
  0x23   :  { %29 = dma.hbm_to_vmem [thread:$0]  %s2056_s0, 2048, %s1702_s30, [#allocation3], %s1648_s17, %s1648_s17, %s1649_s18  }
  0x24   :  { %s1650_s9 = smov [#allocation7]   ;;  %s1572_s13 = scalar_lea.hbm %s2059_s3, 2048 }
  0x25   :  { %s49_s10 = sshll.u32 %s1650_s9, 4  ;;  %p1573_p2 = scmp.ne.s32.totalorder %s2059_s3, %s1572_s13  ;;  %s50_s10 = int_to_ptr.vmem [resolvable:$true] %s49_s10 }
  0x26   :  { %p1576_p3 = scmp.lt.u32.totalorder %s1572_s13, %s2059_s3 }
  0x28   :  { %p1578_p4 = pnand %p1576_p3, %p1573_p2 }
  0x2a   :  { %1581 = shalt.err (!%p1578_p4)
}
  0x2b   :  { %s1582_s20 = scalar_lea.vmem %s50_s10, 2048  ;;  %p1587_p6 = scmp.lt.s32.totalorder %s50_s10, %s50_s10 }
  0x2c   :  { %p1583_p5 = scmp.ne.s32.totalorder %s50_s10, %s1582_s20  ;;  %p1588_p7 = scmp.lt.s32.totalorder %s1582_s20, %s1582_s20 }
  0x2e   :  { %p1589_p8 = por %p1588_p7, %p1587_p6 }
  0x30   :  { %p1590_p9 = pnand %p1589_p8, %p1583_p5 }
  0x32   :  { %1593 = shalt.err (!%p1590_p9)
}
  0x33   :  { %55 = dma.hbm_to_vmem [thread:$0]  %s2059_s3, 2048, %s50_s10, [#allocation6], %s1648_s17, %s1648_s17, %s1649_s18  }
  0x34   :  { %1638 = dma.done.wait [#allocation3], 2048  }
  0x35   :  { %1639 = vsyncadd [#allocation3], 4294965248 }
  0x36   :  { %1640 = dma.done.wait [#allocation6], 4096  }
  0x37   :  { %1641 = vsyncadd [#allocation6], 4294963200  ;;  %v1651_v0 = vmov 0.0|0.0   ;;  %vm1652_vm0 = vmmov 0   ;;  %v1653_v1 = vmov 0.0   ;;  %v1654_v2 = vmov 127  }
  0x38   :  { %1393 = vmatprep.subr.bf16.mxu1 %v1651_v0  ;;  %1302 = vmatprep.mubr.msk.f32.mxu1 %vm1652_vm0, %v1653_v1  ;;  %v87_v3 = vld [vmem:[#allocation5] sm:$0xff]  ;;  %v88_v4 = vld [vmem:[#allocation5 + $0x8] sm:$0xff]  ;;  %v89_v5 = vld [vmem:[#allocation5 + $0x10] sm:$0xff]  ;;  %s1655_s23 = smov [#allocation9]  }
  0x39   :  { %1460 = vset.pattern.permute.xlu0 %v1654_v2  ;;  %1461 = vset.pattern.permute.xlu1 %v1654_v2  ;;  %v1361_v6 = vpack.c.bf16 %v88_v4, %v87_v3  ;;  %v90_v7 = vld [vmem:[#allocation5 + $0x18] sm:$0xff]  ;;  %v91_v9 = vld [vmem:[#allocation5 + $0x20] sm:$0xff]  ;;  %v92_v10 = vld [vmem:[#allocation5 + $0x28] sm:$0xff]  ;;  %s1113_s24 = sshll.u32 %s1655_s23, 4  ;;  %s1114_s24 = int_to_ptr.vmem [resolvable:$true] %s1113_s24 }
  0x3a   :  { %v1365_v8 = vpack.c.bf16 %v90_v7, %v89_v5  ;;  %v1369_v11 = vpack.c.bf16 %v92_v10, %v91_v9  ;;  %v71_v12 = vld [vmem:[#allocation2] sm:$0xff]  ;;  %v72_v13 = vld [vmem:[#allocation2 + $0x8] sm:$0xff]  ;;  %v93_v14 = vld [vmem:[#allocation5 + $0x30] sm:$0xff]  ;;  %p1599_p11 = scmp.lt.s32.totalorder %s1114_s24, %s1114_s24 }
  0x3b   :  { %1362 = vmatprep.subr.bf16.mxu0 %v1361_v6  ;;  %v94_v15 = vld [vmem:[#allocation5 + $0x38] sm:$0xff]  ;;  %1246 = vmatprep.mubr.f32.mxu0 %v71_v12  ;;  %v1394_v16 = vpack.c.bf16 %v72_v13, %v71_v12  ;;  %v95_v18 = vld [vmem:[#allocation5 + $0x40] sm:$0xff]  ;;  %v96_v19 = vld [vmem:[#allocation5 + $0x48] sm:$0xff] }
  0x3c   :  { %1364 = vmatpush3.bf16.msra.mxu0 %v1361_v6  ;;  %v1373_v17 = vpack.c.bf16 %v94_v15, %v93_v14  ;;  %v73_v20 = vld [vmem:[#allocation2 + $0x10] sm:$0xff]  ;;  %v74_v21 = vld [vmem:[#allocation2 + $0x18] sm:$0xff]  ;;  %v1377_v23 = vpack.c.bf16 %v96_v19, %v95_v18  ;;  %v99_v27 = vld [vmem:[#allocation5 + $0x60] sm:$0xff]  ;;  %v399_v14 = vlaneseq }
  0x3d   :  { %1366 = vmatprep.subr.bf16.mxu0 %v1365_v8  ;;  %1395 = vmatpush3.bf16.xpose.msra.mxu1 %v1394_v16  ;;  %v1397_v22 = vpack.c.bf16 %v74_v21, %v73_v20  ;;  %v97_v24 = vld [vmem:[#allocation5 + $0x50] sm:$0xff]  ;;  %v98_v25 = vld [vmem:[#allocation5 + $0x58] sm:$0xff]  ;;  %v100_v28 = vld [vmem:[#allocation5 + $0x68] sm:$0xff] }
  0x3e   :  { %1396 = vmatprep.subr.bf16.mxu1 %v1651_v0  ;;  %v1381_v26 = vpack.c.bf16 %v98_v25, %v97_v24  ;;  %v75_v29 = vld [vmem:[#allocation2 + $0x20] sm:$0xff]  ;;  %v76_v30 = vld [vmem:[#allocation2 + $0x28] sm:$0xff]  ;;  %v1385_v32 = vpack.c.bf16 %v100_v28, %v99_v27  ;;  %v101_v33 = vld [vmem:[#allocation5 + $0x70] sm:$0xff]  ;;  %v400_v15 = vshrl.u32 %v399_v14, 7 }
  0x3f   :  { %v1400_v31 = vpack.c.bf16 %v76_v30, %v75_v29  ;;  %v102_v34 = vld [vmem:[#allocation5 + $0x78] sm:$0xff]  ;;  %v77_v36 = vld [vmem:[#allocation2 + $0x30] sm:$0xff]  ;;  %v79_v39 = vld [vmem:[#allocation2 + $0x40] sm:$0xff] }
  0x40   :  { %1368 = vmatpush3.bf16.msra.mxu0 %v1365_v8  ;;  %v1389_v35 = vpack.c.bf16 %v102_v34, %v101_v33  ;;  %v78_v37 = vld [vmem:[#allocation2 + $0x38] sm:$0xff]  ;;  %v80_v40 = vld [vmem:[#allocation2 + $0x48] sm:$0xff]  ;;  %v81_v42 = vld [vmem:[#allocation2 + $0x50] sm:$0xff]  ;;  %v401_v16 = vsub.s32 0, %v400_v15 }
  0x41   :  { %1370 = vmatprep.subr.bf16.mxu0 %v1369_v11  ;;  %v1403_v38 = vpack.c.bf16 %v78_v37, %v77_v36  ;;  %v1406_v41 = vpack.c.bf16 %v80_v40, %v79_v39  ;;  %v82_v43 = vld [vmem:[#allocation2 + $0x58] sm:$0xff]  ;;  %v83_v45 = vld [vmem:[#allocation2 + $0x60] sm:$0xff]  ;;  %v84_v46 = vld [vmem:[#allocation2 + $0x68] sm:$0xff] }
  0x42   :  { %v1409_v44 = vpack.c.bf16 %v82_v43, %v81_v42  ;;  %v1412_v47 = vpack.c.bf16 %v84_v46, %v83_v45  ;;  %v85_v48 = vld [vmem:[#allocation2 + $0x70] sm:$0xff]  ;;  %v86_v49 = vld [vmem:[#allocation2 + $0x78] sm:$0xff]  ;;  %v248_v51 = vld [vmem:[%s2058_s2] sm:$0x1] }
  0x43   :  { %v1415_v50 = vpack.c.bf16 %v86_v49, %v85_v48  ;;  %v468_v19 = vld [vmem:[#allocation7 + $0x8] sm:$0xff] }
  0x44   :  { %1372 = vmatpush3.bf16.msra.mxu0 %v1369_v11  ;;  %vm484_vm2 = vcmp.gt.f32.partialorder %v468_v19, 0.5 }
  0x45   :  { %1374 = vmatprep.subr.bf16.mxu0 %v1373_v17  ;;  %1398 = vmatpush3.bf16.xpose.msra.mxu1 %v1397_v22 }
  0x46   :  { %1399 = vmatprep.subr.bf16.mxu1 %v1651_v0 }
  0x48   :  { %1376 = vmatpush3.bf16.msra.mxu0 %v1373_v17 }
  0x49   :  { %1378 = vmatprep.subr.bf16.mxu0 %v1377_v23 }
  0x4c   :  { %1380 = vmatpush3.bf16.msra.mxu0 %v1377_v23  ;;  %v467_v23 = vld [vmem:[#allocation7] sm:$0xff] }
  0x4d   :  { %1382 = vmatprep.subr.bf16.mxu0 %v1381_v26  ;;  %1401 = vmatpush3.bf16.xpose.msra.mxu1 %v1400_v31  ;;  %vm483_vm4 = vcmp.gt.f32.partialorder %v467_v23, 0.5  ;;  %v469_v31 = vld [vmem:[#allocation7 + $0x10] sm:$0xff] }
  0x4e   :  { %1402 = vmatprep.subr.bf16.mxu1 %v1651_v0  ;;  %vm485_vm6 = vcmp.gt.f32.partialorder %v469_v31, 0.5 }
  0x50   :  { %1384 = vmatpush3.bf16.msra.mxu0 %v1381_v26 }
  0x51   :  { %1386 = vmatprep.subr.bf16.mxu0 %v1385_v32 }
  0x54   :  { %1388 = vmatpush3.bf16.msra.mxu0 %v1385_v32  ;;  %v471_v32 = vld [vmem:[#allocation7 + $0x20] sm:$0xff] }
  0x55   :  { %1390 = vmatprep.subr.bf16.mxu0 %v1389_v35  ;;  %1404 = vmatpush3.bf16.xpose.msra.mxu1 %v1403_v38  ;;  %vm487_vm7 = vcmp.gt.f32.partialorder %v471_v32, 0.5 }
  0x56   :  { %1405 = vmatprep.subr.bf16.mxu1 %v1651_v0 }
  0x58   :  { %1392 = vmatpush3.bf16.msra.mxu0 %v1389_v35 }
  0x5b   :  { %1247 = vmatmul.mubr.f32.vlgmr.msra.gmra.mrb[0].mxu0 %v72_v13 }
  0x5c   :  { %1249 = vmatprep.mubr.f32.mxu0 %v73_v20 }
  0x5d   :  { %1407 = vmatpush3.bf16.xpose.msra.mxu1 %v1406_v41  ;;  %v473_v41 = vld [vmem:[#allocation7 + $0x30] sm:$0xff] }
  0x5e   :  { %1408 = vmatprep.subr.bf16.mxu1 %v1651_v0  ;;  %vm489_vm11 = vcmp.gt.f32.partialorder %v473_v41, 0.5 }
  0x5f   :  { %1250 = vmatmul.mubr.f32.gmra.mrb[2].mxu0 %v74_v21 }
  0x60   :  { %1252 = vmatprep.mubr.f32.mxu0 %v75_v29 }
  0x63   :  { %1253 = vmatmul.mubr.f32.gmra.mrb[4].mxu0 %v76_v30 }
  0x64   :  { %1255 = vmatprep.mubr.f32.mxu0 %v77_v36 }
  0x65   :  { %1410 = vmatpush3.bf16.xpose.msra.mxu1 %v1409_v44 }
  0x66   :  { %1411 = vmatprep.subr.bf16.mxu1 %v1651_v0 }
  0x67   :  { %1256 = vmatmul.mubr.f32.gmra.mrb[6].mxu0 %v78_v37 }
  0x68   :  { %1258 = vmatprep.mubr.f32.mxu0 %v79_v39 }
  0x6b   :  { %1259 = vmatmul.mubr.f32.gmra.mrb[8].mxu0 %v80_v40  ;;  %v470_v40 = vld [vmem:[#allocation7 + $0x18] sm:$0xff] }
  0x6c   :  { %1261 = vmatprep.mubr.f32.mxu0 %v81_v42  ;;  %vm486_vm10 = vcmp.gt.f32.partialorder %v470_v40, 0.5 }
  0x6d   :  { %1413 = vmatpush3.bf16.xpose.msra.mxu1 %v1412_v47 }
  0x6e   :  { %1414 = vmatprep.subr.bf16.mxu1 %v1651_v0 }
  0x6f   :  { %1262 = vmatmul.mubr.f32.gmra.mrb[10].mxu0 %v82_v43 }
  0x70   :  { %1264 = vmatprep.mubr.f32.mxu0 %v83_v45 }
  0x73   :  { %1265 = vmatmul.mubr.f32.gmra.mrb[12].mxu0 %v84_v46 }
  0x74   :  { %1267 = vmatprep.mubr.f32.mxu0 %v85_v48 }
  0x75   :  { %1416 = vmatpush3.bf16.xpose.msra.mxu1 %v1415_v50 }
  0x77   :  { %1268 = vmatmul.mubr.f32.gmra.mrb[14].mxu0 %v86_v49 }
  0x7c   :  { %1303 = vmatmul.mubr.f32.vlgmr.msra.gmra.mrb[0].mxu1 %v248_v51 }
 0x12e   :  { %v1248_v52 = vpop.f32.mrb[0].mxu0 }
 0x12f   :  { %326 = vperm.xlu0 %1460, %v1248_v52   ;;  %v169_v53 = vpop.f32.mrb[1].mxu0 }
 0x130   :  { %v1417_v54 = vpack.c.bf16 %v1248_v52, %v169_v53  ;;  %v472_v52 = vld [vmem:[#allocation7 + $0x28] sm:$0xff] }
 0x131   :  { %vm488_vm14 = vcmp.gt.f32.partialorder %v472_v52, 0.5 }
 0x132   :  { %v1251_v55 = vpop.f32.mrb[2].mxu0  ;;  %1418 = vmatprep.subr.bf16.mxu0 %v1417_v54 }
 0x133   :  { %321 = vperm.xlu0 %1460, %v169_v53   ;;  %v179_v56 = vpop.f32.mrb[3].mxu0  ;;  %1420 = vmatpush3.bf16.msra.mxu0 %v1417_v54  ;;  %v475_v53 = vld [vmem:[#allocation7 + $0x40] sm:$0xff] }
 0x134   :  { %v1421_v57 = vpack.c.bf16 %v1251_v55, %v179_v56  ;;  %331 = vperm.xlu1 %1461, %v179_v56   ;;  %vm491_vm15 = vcmp.gt.f32.partialorder %v475_v53, 0.5 }
 0x136   :  { %v1254_v58 = vpop.f32.mrb[4].mxu0  ;;  %1422 = vmatprep.subr.bf16.mxu0 %v1421_v57 }
 0x137   :  { %v189_v59 = vpop.f32.mrb[5].mxu0  ;;  %1424 = vmatpush3.bf16.msra.mxu0 %v1421_v57 }
 0x138   :  { %v1425_v60 = vpack.c.bf16 %v1254_v58, %v189_v59  ;;  %336 = vperm.xlu1 %1461, %v1251_v55   ;;  %341 = vperm.xlu0 %1460, %v189_v59  }
 0x13a   :  { %v1257_v61 = vpop.f32.mrb[6].mxu0  ;;  %1426 = vmatprep.subr.bf16.mxu0 %v1425_v60 }
 0x13b   :  { %v199_v62 = vpop.f32.mrb[7].mxu0  ;;  %1428 = vmatpush3.bf16.msra.mxu0 %v1425_v60 }
 0x13c   :  { %v1429_v63 = vpack.c.bf16 %v1257_v61, %v199_v62  ;;  %346 = vperm.xlu1 %1461, %v1254_v58   ;;  %351 = vperm.xlu0 %1460, %v199_v62  }
 0x13e   :  { %v1260_v0 = vpop.f32.mrb[8].mxu0  ;;  %1430 = vmatprep.subr.bf16.mxu0 %v1429_v63 }
 0x13f   :  { %v209_v1 = vpop.f32.mrb[9].mxu0  ;;  %1432 = vmatpush3.bf16.msra.mxu0 %v1429_v63 }
 0x140   :  { %v1433_v2 = vpack.c.bf16 %v1260_v0, %v209_v1  ;;  %356 = vperm.xlu1 %1461, %v1257_v61   ;;  %361 = vperm.xlu0 %1460, %v209_v1   ;;  %v477_v1 = vld [vmem:[#allocation7 + $0x50] sm:$0xff] }
 0x142   :  { %v1263_v3 = vpop.f32.mrb[10].mxu0  ;;  %1434 = vmatprep.subr.bf16.mxu0 %v1433_v2 }
 0x143   :  { %v219_v4 = vpop.f32.mrb[11].mxu0  ;;  %1436 = vmatpush3.bf16.msra.mxu0 %v1433_v2 }
 0x144   :  { %v1437_v5 = vpack.c.bf16 %v1263_v3, %v219_v4  ;;  %366 = vperm.xlu1 %1461, %v1260_v0   ;;  %371 = vperm.xlu0 %1460, %v219_v4   ;;  %v474_v0 = vld [vmem:[#allocation7 + $0x38] sm:$0xff] }
 0x146   :  { %v1266_v6 = vpop.f32.mrb[12].mxu0  ;;  %1438 = vmatprep.subr.bf16.mxu0 %v1437_v5 }
 0x147   :  { %v229_v7 = vpop.f32.mrb[13].mxu0  ;;  %1440 = vmatpush3.bf16.msra.mxu0 %v1437_v5 }
 0x148   :  { %v1441_v8 = vpack.c.bf16 %v1266_v6, %v229_v7  ;;  %376 = vperm.xlu1 %1461, %v1263_v3   ;;  %381 = vperm.xlu0 %1460, %v229_v7  }
 0x14a   :  { %v1269_v9 = vpop.f32.mrb[14].mxu0  ;;  %1442 = vmatprep.subr.bf16.mxu0 %v1441_v8 }
 0x14b   :  { %v239_v10 = vpop.f32.mrb[15].mxu0  ;;  %1444 = vmatpush3.bf16.msra.mxu0 %v1441_v8 }
 0x14c   :  { %v1445_v11 = vpack.c.bf16 %v1269_v9, %v239_v10  ;;  %386 = vperm.xlu1 %1461, %v1266_v6   ;;  %391 = vperm.xlu0 %1460, %v239_v10  }
 0x14e   :  { %1446 = vmatprep.subr.bf16.mxu0 %v1445_v11 }
 0x14f   :  { %1448 = vmatpush3.bf16.msra.mxu0 %v1445_v11  ;;  %v315_v12 = vpop.f32.mrb[0].mxu1 }
 0x150   :  { %396 = vperm.xlu1 %1461, %v1269_v9   ;;  %v1304_v13 = vpop.f32.mrb[1].mxu1  ;;  %v1765_v17 = vrot.slane %v315_v12, %v401_v16  ;;  %v476_v12 = vld [vmem:[#allocation7 + $0x48] sm:$0xff] }
 0x151   :  { %v479_v13 = vld [vmem:[#allocation7 + $0x60] sm:$0xff] }
 0x1ae   :  { %v327_v18 = vpop.permute.xlu0 %326 }
 0x1af   :  { %v404_v20 = vadd.f32 %v1765_v17, %v327_v18 }
 0x1b1   :  { %v436_v21 = vmul.f32 0.2, %v404_v20  ;;  %vm420_vm1 = vcmp.gt.f32.partialorder %v404_v20, 0.0 }
 0x1b2   :  { %v322_v22 = vpop.permute.xlu0 %321 }
 0x1b3   :  { %v403_v24 = vadd.f32 %v1765_v17, %v322_v22  ;;  %v332_v25 = vpop.permute.xlu1 %331  ;;  %v452_v26 = vsel %vm420_vm1, %v404_v20, %v436_v21 }
 0x1b4   :  { %v405_v27 = vadd.f32 %v1765_v17, %v332_v25  ;;  %v1770_v28 = vsel %vm484_vm2, %v452_v26, -1e+30  ;;  %vm490_vm2 = vcmp.gt.f32.partialorder %v474_v0, 0.5  ;;  %v478_v25 = vld [vmem:[#allocation7 + $0x58] sm:$0xff]  ;;  %v481_v26 = vld [vmem:[#allocation7 + $0x70] sm:$0xff] }
 0x1b5   :  { %v435_v29 = vmul.f32 0.2, %v403_v24  ;;  %517 = vmax.xlane.f32.xlu1 %v1770_v28  ;;  %vm419_vm3 = vcmp.gt.f32.partialorder %v403_v24, 0.0 }
 0x1b6   :  { %v437_v30 = vmul.f32 0.2, %v405_v27  ;;  %vm421_vm5 = vcmp.gt.f32.partialorder %v405_v27, 0.0 }
 0x1b7   :  { %v337_v33 = vpop.permute.xlu1 %336  ;;  %v342_v34 = vpop.permute.xlu0 %341  ;;  %v451_v35 = vsel %vm419_vm3, %v403_v24, %v435_v29  ;;  %vm493_vm3 = vcmp.gt.f32.partialorder %v477_v1, 0.5 }
 0x1b8   :  { %v406_v36 = vadd.f32 %v1765_v17, %v337_v33  ;;  %v407_v37 = vadd.f32 %v1765_v17, %v342_v34  ;;  %v1775_v38 = vsel %vm483_vm4, %v451_v35, -1e+30  ;;  %v453_v39 = vsel %vm421_vm5, %v405_v27, %v437_v30 }
 0x1b9   :  { %515 = vmax.xlane.f32.xlu0 %v1775_v38  ;;  %v1780_v48 = vsel %vm485_vm6, %v453_v39, -1e+30  ;;  %vm492_vm6 = vcmp.gt.f32.partialorder %v476_v12, 0.5  ;;  %v480_v39 = vld [vmem:[#allocation7 + $0x68] sm:$0xff] }
 0x1ba   :  { %v438_v42 = vmul.f32 0.2, %v406_v36  ;;  %v439_v43 = vmul.f32 0.2, %v407_v37  ;;  %vm423_vm8 = vcmp.gt.f32.partialorder %v407_v37, 0.0  ;;  %vm422_vm9 = vcmp.gt.f32.partialorder %v406_v36, 0.0 }
 0x1bb   :  { %v347_v44 = vpop.permute.xlu1 %346  ;;  %v352_v45 = vpop.permute.xlu0 %351 }
 0x1bc   :  { %v408_v46 = vadd.f32 %v1765_v17, %v347_v44  ;;  %v409_v47 = vadd.f32 %v1765_v17, %v352_v45  ;;  %v455_v49 = vsel %vm423_vm8, %v407_v37, %v439_v43  ;;  %v454_v51 = vsel %vm422_vm9, %v406_v36, %v438_v42 }
 0x1bd   :  { %519 = vmax.xlane.f32.xlu0 %v1780_v48  ;;  %v1783_v50 = vsel %vm487_vm7, %v455_v49, -1e+30  ;;  %v1788_v60 = vsel %vm486_vm10, %v454_v51, -1e+30  ;;  %vm495_vm7 = vcmp.gt.f32.partialorder %v479_v13, 0.5  ;;  %vm494_vm10 = vcmp.gt.f32.partialorder %v478_v25, 0.5 }
 0x1be   :  { %v440_v54 = vmul.f32 0.2, %v408_v46  ;;  %v441_v55 = vmul.f32 0.2, %v409_v47  ;;  %523 = vmax.xlane.f32.xlu1 %v1783_v50  ;;  %vm425_vm12 = vcmp.gt.f32.partialorder %v409_v47, 0.0  ;;  %vm424_vm13 = vcmp.gt.f32.partialorder %v408_v46, 0.0 }
 0x1bf   :  { %v357_v56 = vpop.permute.xlu1 %356  ;;  %v362_v57 = vpop.permute.xlu0 %361  ;;  %v482_v51 = vld [vmem:[#allocation7 + $0x78] sm:$0xff] }
 0x1c0   :  { %v410_v58 = vadd.f32 %v1765_v17, %v357_v56  ;;  %v411_v59 = vadd.f32 %v1765_v17, %v362_v57  ;;  %v457_v61 = vsel %vm425_vm12, %v409_v47, %v441_v55  ;;  %v456_v63 = vsel %vm424_vm13, %v408_v46, %v440_v54 }
 0x1c1   :  { %521 = vmax.xlane.f32.xlu0 %v1788_v60  ;;  %v1791_v62 = vsel %vm489_vm11, %v457_v61, -1e+30  ;;  %v1796_v8 = vsel %vm488_vm14, %v456_v63, -1e+30  ;;  %vm497_vm11 = vcmp.gt.f32.partialorder %v481_v26, 0.5  ;;  %vm496_vm14 = vcmp.gt.f32.partialorder %v480_v39, 0.5 }
 0x1c2   :  { %v442_v2 = vmul.f32 0.2, %v410_v58  ;;  %v443_v3 = vmul.f32 0.2, %v411_v59  ;;  %527 = vmax.xlane.f32.xlu1 %v1791_v62  ;;  %vm427_vm0 = vcmp.gt.f32.partialorder %v411_v59, 0.0  ;;  %vm426_vm1 = vcmp.gt.f32.partialorder %v410_v58, 0.0 }
 0x1c3   :  { %v367_v4 = vpop.permute.xlu1 %366  ;;  %v372_v5 = vpop.permute.xlu0 %371 }
 0x1c4   :  { %v412_v6 = vadd.f32 %v1765_v17, %v367_v4  ;;  %v413_v7 = vadd.f32 %v1765_v17, %v372_v5  ;;  %v459_v9 = vsel %vm427_vm0, %v411_v59, %v443_v3  ;;  %v458_v11 = vsel %vm426_vm1, %v410_v58, %v442_v2 }
 0x1c5   :  { %525 = vmax.xlane.f32.xlu0 %v1796_v8  ;;  %v1799_v10 = vsel %vm491_vm15, %v459_v9, -1e+30  ;;  %v1804_v21 = vsel %vm490_vm2, %v458_v11, -1e+30  ;;  %vm498_vm0 = vcmp.gt.f32.partialorder %v482_v51, 0.5 }
 0x1c6   :  { %v444_v14 = vmul.f32 0.2, %v412_v6  ;;  %v445_v15 = vmul.f32 0.2, %v413_v7  ;;  %531 = vmax.xlane.f32.xlu1 %v1799_v10  ;;  %vm429_vm4 = vcmp.gt.f32.partialorder %v413_v7, 0.0  ;;  %vm428_vm5 = vcmp.gt.f32.partialorder %v412_v6, 0.0 }
 0x1c7   :  { %v377_v16 = vpop.permute.xlu1 %376  ;;  %v382_v18 = vpop.permute.xlu0 %381 }
 0x1c8   :  { %v414_v19 = vadd.f32 %v1765_v17, %v377_v16  ;;  %v415_v20 = vadd.f32 %v1765_v17, %v382_v18  ;;  %v461_v22 = vsel %vm429_vm4, %v413_v7, %v445_v15  ;;  %v460_v24 = vsel %vm428_vm5, %v412_v6, %v444_v14 }
 0x1c9   :  { %529 = vmax.xlane.f32.xlu0 %v1804_v21  ;;  %v1807_v23 = vsel %vm493_vm3, %v461_v22, -1e+30  ;;  %v1812_v34 = vsel %vm492_vm6, %v460_v24, -1e+30 }
 0x1ca   :  { %v446_v27 = vmul.f32 0.2, %v414_v19  ;;  %v447_v29 = vmul.f32 0.2, %v415_v20  ;;  %535 = vmax.xlane.f32.xlu1 %v1807_v23  ;;  %vm431_vm8 = vcmp.gt.f32.partialorder %v415_v20, 0.0  ;;  %vm430_vm9 = vcmp.gt.f32.partialorder %v414_v19, 0.0 }
 0x1cb   :  { %v387_v30 = vpop.permute.xlu1 %386  ;;  %v392_v31 = vpop.permute.xlu0 %391 }
 0x1cc   :  { %v416_v32 = vadd.f32 %v1765_v17, %v387_v30  ;;  %v417_v33 = vadd.f32 %v1765_v17, %v392_v31  ;;  %v463_v35 = vsel %vm431_vm8, %v415_v20, %v447_v29  ;;  %v462_v37 = vsel %vm430_vm9, %v414_v19, %v446_v27 }
 0x1cd   :  { %533 = vmax.xlane.f32.xlu0 %v1812_v34  ;;  %v1815_v36 = vsel %vm495_vm7, %v463_v35, -1e+30  ;;  %v1819_v44 = vsel %vm494_vm10, %v462_v37, -1e+30 }
 0x1ce   :  { %v448_v40 = vmul.f32 0.2, %v416_v32  ;;  %v449_v41 = vmul.f32 0.2, %v417_v33  ;;  %539 = vmax.xlane.f32.xlu1 %v1815_v36  ;;  %vm433_vm12 = vcmp.gt.f32.partialorder %v417_v33, 0.0  ;;  %vm432_vm13 = vcmp.gt.f32.partialorder %v416_v32, 0.0 }
 0x1cf   :  { %v397_v42 = vpop.permute.xlu1 %396 }
 0x1d0   :  { %v418_v43 = vadd.f32 %v1765_v17, %v397_v42  ;;  %v465_v45 = vsel %vm433_vm12, %v417_v33, %v449_v41  ;;  %v464_v47 = vsel %vm432_vm13, %v416_v32, %v448_v40 }
 0x1d1   :  { %537 = vmax.xlane.f32.xlu0 %v1819_v44  ;;  %v1822_v46 = vsel %vm497_vm11, %v465_v45, -1e+30  ;;  %v1825_v52 = vsel %vm496_vm14, %v464_v47, -1e+30 }
 0x1d2   :  { %v450_v49 = vmul.f32 0.2, %v418_v43  ;;  %543 = vmax.xlane.f32.xlu1 %v1822_v46  ;;  %vm434_vm15 = vcmp.gt.f32.partialorder %v418_v43, 0.0 }
 0x1d4   :  { %v466_v53 = vsel %vm434_vm15, %v418_v43, %v450_v49 }
 0x1d5   :  { %541 = vmax.xlane.f32.xlu0 %v1825_v52  ;;  %v1828_v17 = vsel %vm498_vm0, %v466_v53, -1e+30 }
 0x1d9   :  { %545 = vmax.xlane.f32.xlu0 %v1828_v17 }
 0x242   :  { %v518_v54 = vpop.xlane.xlu1 %517 }
 0x243   :  { %v548_v55 = vsub.f32 %v1770_v28, %v518_v54 }
 0x245   :  { %v565_v56 = vmul.f32 1.442695, %v548_v55 }
 0x246   :  { %v516_v57 = vpop.xlane.xlu0 %515 }
 0x247   :  { %1462 = vpow2.f32 %v565_v56  ;;  %v547_v58 = vsub.f32 %v1775_v38, %v516_v57 }
 0x249   :  { %v563_v59 = vmul.f32 1.442695, %v547_v58 }
 0x24a   :  { %v520_v61 = vpop.xlane.xlu0 %519 }
 0x24b   :  { %1464 = vpow2.f32 %v563_v59  ;;  %v549_v63 = vsub.f32 %v1780_v48, %v520_v61  ;;  %v524_v0 = vpop.xlane.xlu1 %523 }
 0x24c   :  { %v551_v1 = vsub.f32 %v1783_v50, %v524_v0 }
 0x24d   :  { %v567_v2 = vmul.f32 1.442695, %v549_v63 }
 0x24e   :  { %v571_v3 = vmul.f32 1.442695, %v551_v1  ;;  %v522_v4 = vpop.xlane.xlu0 %521 }
 0x24f   :  { %1466 = vpow2.f32 %v567_v2  ;;  %v550_v5 = vsub.f32 %v1788_v60, %v522_v4  ;;  %v528_v28 = vpop.xlane.xlu1 %527 }
 0x250   :  { %v553_v6 = vsub.f32 %v1791_v62, %v528_v28  ;;  %1468 = vpow2.f32 %v571_v3 }
 0x251   :  { %v1837_v7 = vpop.eup %1462  ;;  %v569_v38 = vmul.f32 1.442695, %v550_v5 }
 0x252   :  { %v575_v9 = vmul.f32 1.442695, %v553_v6  ;;  %597 = vadd.xlane.f32.xlu0 %v1837_v7  ;;  %v526_v48 = vpop.xlane.xlu0 %525 }
 0x253   :  { %1470 = vpow2.f32 %v569_v38  ;;  %v552_v50 = vsub.f32 %v1796_v8, %v526_v48  ;;  %v532_v11 = vpop.xlane.xlu1 %531 }
 0x254   :  { %v555_v12 = vsub.f32 %v1799_v10, %v532_v11  ;;  %1472 = vpow2.f32 %v575_v9 }
 0x255   :  { %v1842_v13 = vpop.eup %1464  ;;  %v573_v60 = vmul.f32 1.442695, %v552_v50 }
 0x256   :  { %v579_v14 = vmul.f32 1.442695, %v555_v12  ;;  %595 = vadd.xlane.f32.xlu1 %v1842_v13  ;;  %v530_v62 = vpop.xlane.xlu0 %529 }
 0x257   :  { %1474 = vpow2.f32 %v573_v60  ;;  %v554_v15 = vsub.f32 %v1804_v21, %v530_v62  ;;  %v536_v16 = vpop.xlane.xlu1 %535 }
 0x258   :  { %v557_v18 = vsub.f32 %v1807_v23, %v536_v16  ;;  %1476 = vpow2.f32 %v579_v14 }
 0x259   :  { %v1847_v19 = vpop.eup %1466  ;;  %v577_v8 = vmul.f32 1.442695, %v554_v15 }
 0x25a   :  { %v583_v20 = vmul.f32 1.442695, %v557_v18  ;;  %599 = vadd.xlane.f32.xlu1 %v1847_v19  ;;  %v534_v10 = vpop.xlane.xlu0 %533  ;;  %v1851_v25 = vpop.eup %1468 }
 0x25b   :  { %1478 = vpow2.f32 %v577_v8  ;;  %v556_v22 = vsub.f32 %v1812_v34, %v534_v10  ;;  %v540_v24 = vpop.xlane.xlu1 %539 }
 0x25c   :  { %v559_v26 = vsub.f32 %v1815_v36, %v540_v24  ;;  %1480 = vpow2.f32 %v583_v20 }
 0x25d   :  { %v1854_v21 = vpop.eup %1470  ;;  %v581_v27 = vmul.f32 1.442695, %v556_v22 }
 0x25e   :  { %v587_v23 = vmul.f32 1.442695, %v559_v26  ;;  %603 = vadd.xlane.f32.xlu1 %v1851_v25  ;;  %601 = vadd.xlane.f32.xlu0 %v1854_v21  ;;  %v538_v29 = vpop.xlane.xlu0 %537  ;;  %v1859_v32 = vpop.eup %1472 }
 0x25f   :  { %1482 = vpow2.f32 %v581_v27  ;;  %v558_v30 = vsub.f32 %v1819_v44, %v538_v29  ;;  %v544_v31 = vpop.xlane.xlu1 %543 }
 0x260   :  { %v561_v33 = vsub.f32 %v1822_v46, %v544_v31  ;;  %1484 = vpow2.f32 %v587_v23 }
 0x261   :  { %v1862_v34 = vpop.eup %1474  ;;  %v585_v35 = vmul.f32 1.442695, %v558_v30 }
 0x262   :  { %v591_v36 = vmul.f32 1.442695, %v561_v33  ;;  %607 = vadd.xlane.f32.xlu1 %v1859_v32  ;;  %605 = vadd.xlane.f32.xlu0 %v1862_v34  ;;  %v542_v37 = vpop.xlane.xlu0 %541  ;;  %v1867_v40 = vpop.eup %1476 }
 0x263   :  { %1486 = vpow2.f32 %v585_v35  ;;  %v560_v39 = vsub.f32 %v1825_v52, %v542_v37 }
 0x264   :  { %1488 = vpow2.f32 %v591_v36  ;;  %v1914_v36 = vld [vmem:[%s2060_s4] ss:$0 sm:$0xff]  ;;  %s1594_s4 = scalar_lea.vmem %s1114_s24, 2048 }
 0x265   :  { %v1869_v41 = vpop.eup %1478  ;;  %v589_v42 = vmul.f32 1.442695, %v560_v39  ;;  %p1595_p10 = scmp.ne.s32.totalorder %s1114_s24, %s1594_s4  ;;  %p1600_p12 = scmp.lt.s32.totalorder %s1594_s4, %s1594_s4 }
 0x266   :  { %611 = vadd.xlane.f32.xlu1 %v1867_v40  ;;  %609 = vadd.xlane.f32.xlu0 %v1869_v41  ;;  %v546_v43 = vpop.xlane.xlu0 %545  ;;  %v1874_v45 = vpop.eup %1480 }
 0x267   :  { %1490 = vpow2.f32 %v589_v42  ;;  %v562_v44 = vsub.f32 %v1828_v17, %v546_v43  ;;  %p1601_p13 = por %p1600_p12, %p1599_p11 }
 0x269   :  { %v1876_v46 = vpop.eup %1482  ;;  %v593_v47 = vmul.f32 1.442695, %v562_v44  ;;  %p1602_p0 = pnand %p1601_p13, %p1595_p10 }
 0x26a   :  { %615 = vadd.xlane.f32.xlu1 %v1874_v45  ;;  %613 = vadd.xlane.f32.xlu0 %v1876_v46  ;;  %v1880_v49 = vpop.eup %1484 }
 0x26b   :  { %1492 = vpow2.f32 %v593_v47 }
 0x26d   :  { %v1882_v51 = vpop.eup %1486 }
 0x26e   :  { %619 = vadd.xlane.f32.xlu1 %v1880_v49  ;;  %617 = vadd.xlane.f32.xlu0 %v1882_v51  ;;  %v1886_v52 = vpop.eup %1488 }
 0x271   :  { %v1888_v53 = vpop.eup %1490 }
 0x272   :  { %623 = vadd.xlane.f32.xlu1 %v1886_v52  ;;  %621 = vadd.xlane.f32.xlu0 %v1888_v53 }
 0x275   :  { %v1892_v17 = vpop.eup %1492 }
 0x276   :  { %625 = vadd.xlane.f32.xlu0 %v1892_v17 }
 0x2df   :  { %v598_v54 = vpop.xlane.xlu0 %597 }
 0x2e0   :  { %1494 = vrcp.f32 %v598_v54 }
 0x2e3   :  { %v596_v55 = vpop.xlane.xlu1 %595 }
 0x2e4   :  { %1496 = vrcp.f32 %v596_v55 }
 0x2e7   :  { %v600_v56 = vpop.xlane.xlu1 %599 }
 0x2e8   :  { %1498 = vrcp.f32 %v600_v56 }
 0x2ea   :  { %v1495_v57 = vpop.eup %1494 }
 0x2eb   :  { %v644_v58 = vmul.f32 %v1495_v57, %v1837_v7  ;;  %v604_v59 = vpop.xlane.xlu1 %603  ;;  %v602_v61 = vpop.xlane.xlu0 %601 }
 0x2ec   :  { %1500 = vrcp.f32 %v604_v59 }
 0x2ed   :  { %660 = vst [vmem:[#allocation9 + $0x8] sm:$0xff] %v644_v58  ;;  %1502 = vrcp.f32 %v602_v61 }
 0x2ee   :  { %v1497_v63 = vpop.eup %1496 }
 0x2ef   :  { %v608_v0 = vpop.xlane.xlu1 %607  ;;  %v606_v1 = vpop.xlane.xlu0 %605  ;;  %v643_v2 = vmul.f32 %v1497_v63, %v1842_v13 }
 0x2f0   :  { %1504 = vrcp.f32 %v608_v0 }
 0x2f1   :  { %1506 = vrcp.f32 %v606_v1  ;;  %659 = vst [vmem:[#allocation9] sm:$0xff] %v643_v2  ;;  %1337 = vmatprep.mubr.f32.mxu0 %v643_v2 }
 0x2f2   :  { %v1499_v3 = vpop.eup %1498  ;;  %1338 = vmatmul.mubr.f32.vlgmr.msra.gmra.mrb[16].mxu0 %v644_v58 }
 0x2f3   :  { %v612_v4 = vpop.xlane.xlu1 %611  ;;  %v610_v5 = vpop.xlane.xlu0 %609  ;;  %v645_v28 = vmul.f32 %v1499_v3, %v1847_v19 }
 0x2f4   :  { %1508 = vrcp.f32 %v612_v4 }
 0x2f5   :  { %1510 = vrcp.f32 %v610_v5  ;;  %661 = vst [vmem:[#allocation9 + $0x10] sm:$0xff] %v645_v28  ;;  %1340 = vmatprep.mubr.f32.mxu0 %v645_v28 }
 0x2f6   :  { %v1501_v6 = vpop.eup %1500 }
 0x2f7   :  { %v1503_v7 = vpop.eup %1502  ;;  %v616_v38 = vpop.xlane.xlu1 %615  ;;  %v647_v48 = vmul.f32 %v1501_v6, %v1851_v25 }
 0x2f8   :  { %v614_v9 = vpop.xlane.xlu0 %613  ;;  %1512 = vrcp.f32 %v616_v38  ;;  %v646_v50 = vmul.f32 %v1503_v7, %v1854_v21 }
 0x2f9   :  { %1514 = vrcp.f32 %v614_v9  ;;  %663 = vst [vmem:[#allocation9 + $0x20] sm:$0xff] %v647_v48 }
 0x2fa   :  { %v1505_v11 = vpop.eup %1504  ;;  %662 = vst [vmem:[#allocation9 + $0x18] sm:$0xff] %v646_v50  ;;  %1341 = vmatmul.mubr.f32.gmra.mrb[18].mxu0 %v646_v50 }
 0x2fb   :  { %v1507_v12 = vpop.eup %1506  ;;  %1343 = vmatprep.mubr.f32.mxu0 %v647_v48  ;;  %v620_v13 = vpop.xlane.xlu1 %619  ;;  %v649_v14 = vmul.f32 %v1505_v11, %v1859_v32 }
 0x2fc   :  { %v618_v60 = vpop.xlane.xlu0 %617  ;;  %1516 = vrcp.f32 %v620_v13  ;;  %v648_v62 = vmul.f32 %v1507_v12, %v1862_v34 }
 0x2fd   :  { %1518 = vrcp.f32 %v618_v60  ;;  %665 = vst [vmem:[#allocation9 + $0x30] sm:$0xff] %v649_v14 }
 0x2fe   :  { %v1509_v15 = vpop.eup %1508  ;;  %664 = vst [vmem:[#allocation9 + $0x28] sm:$0xff] %v648_v62  ;;  %1344 = vmatmul.mubr.f32.gmra.mrb[20].mxu0 %v648_v62 }
 0x2ff   :  { %v1511_v16 = vpop.eup %1510  ;;  %1346 = vmatprep.mubr.f32.mxu0 %v649_v14  ;;  %v624_v18 = vpop.xlane.xlu1 %623  ;;  %v651_v8 = vmul.f32 %v1509_v15, %v1867_v40 }
 0x300   :  { %v622_v19 = vpop.xlane.xlu0 %621  ;;  %1520 = vrcp.f32 %v624_v18  ;;  %v650_v20 = vmul.f32 %v1511_v16, %v1869_v41 }
 0x301   :  { %1522 = vrcp.f32 %v622_v19  ;;  %667 = vst [vmem:[#allocation9 + $0x40] sm:$0xff] %v651_v8 }
 0x302   :  { %v1513_v10 = vpop.eup %1512  ;;  %666 = vst [vmem:[#allocation9 + $0x38] sm:$0xff] %v650_v20  ;;  %1347 = vmatmul.mubr.f32.gmra.mrb[22].mxu0 %v650_v20 }
 0x303   :  { %v1515_v22 = vpop.eup %1514  ;;  %1349 = vmatprep.mubr.f32.mxu0 %v651_v8  ;;  %v653_v25 = vmul.f32 %v1513_v10, %v1874_v45 }
 0x304   :  { %v626_v24 = vpop.xlane.xlu0 %625  ;;  %v652_v26 = vmul.f32 %v1515_v22, %v1876_v46 }
 0x305   :  { %1524 = vrcp.f32 %v626_v24  ;;  %669 = vst [vmem:[#allocation9 + $0x50] sm:$0xff] %v653_v25 }
 0x306   :  { %v1517_v21 = vpop.eup %1516  ;;  %668 = vst [vmem:[#allocation9 + $0x48] sm:$0xff] %v652_v26  ;;  %1350 = vmatmul.mubr.f32.gmra.mrb[24].mxu0 %v652_v26 }
 0x307   :  { %v1519_v27 = vpop.eup %1518  ;;  %1352 = vmatprep.mubr.f32.mxu0 %v653_v25  ;;  %v655_v23 = vmul.f32 %v1517_v21, %v1880_v49 }
 0x308   :  { %v654_v29 = vmul.f32 %v1519_v27, %v1882_v51 }
 0x309   :  { %671 = vst [vmem:[#allocation9 + $0x60] sm:$0xff] %v655_v23 }
 0x30a   :  { %v1521_v30 = vpop.eup %1520  ;;  %670 = vst [vmem:[#allocation9 + $0x58] sm:$0xff] %v654_v29  ;;  %1353 = vmatmul.mubr.f32.gmra.mrb[26].mxu0 %v654_v29 }
 0x30b   :  { %v1523_v31 = vpop.eup %1522  ;;  %1355 = vmatprep.mubr.f32.mxu0 %v655_v23  ;;  %v657_v32 = vmul.f32 %v1521_v30, %v1886_v52 }
 0x30c   :  { %v656_v33 = vmul.f32 %v1523_v31, %v1888_v53 }
 0x30d   :  { %673 = vst [vmem:[#allocation9 + $0x70] sm:$0xff] %v657_v32 }
 0x30e   :  { %672 = vst [vmem:[#allocation9 + $0x68] sm:$0xff] %v656_v33  ;;  %1356 = vmatmul.mubr.f32.gmra.mrb[28].mxu0 %v656_v33 }
 0x30f   :  { %v1525_v34 = vpop.eup %1524  ;;  %1358 = vmatprep.mubr.f32.mxu0 %v657_v32 }
 0x310   :  { %v658_v35 = vmul.f32 %v1525_v34, %v1892_v17 }
 0x312   :  { %674 = vst [vmem:[#allocation9 + $0x78] sm:$0xff] %v658_v35  ;;  %1359 = vmatmul.mubr.f32.gmra.mrb[30].mxu0 %v658_v35 }
 0x3c5   :  { %v1339_v37 = vpop.f32.mrb[16].mxu0 }
 0x3c6   :  { %v1917_v39 = vadd.f32 %v1339_v37, %v1914_v36  ;;  %v748_v40 = vpop.f32.mrb[17].mxu0 }
 0x3c7   :  { %v1920_v41 = vadd.f32 %v1914_v36, %v748_v40 }
 0x3c9   :  { %v908_v42 = vadd.f32 %v1917_v39, %v1920_v41 }
 0x3cd   :  { %v1342_v43 = vpop.f32.mrb[18].mxu0 }
 0x3ce   :  { %v758_v44 = vpop.f32.mrb[19].mxu0  ;;  %v1928_v46 = vadd.f32 %v1342_v43, %v1914_v36 }
 0x3cf   :  { %v1925_v45 = vadd.f32 %v1914_v36, %v758_v44 }
 0x3d1   :  { %v909_v47 = vadd.f32 %v908_v42, %v1925_v45  ;;  %v1345_v49 = vpop.f32.mrb[20].mxu0 }
 0x3d2   :  { %v768_v51 = vpop.f32.mrb[21].mxu0 }
 0x3d3   :  { %1605 = shalt.err (!%p1602_p0)
}
 0x3d4   :  { %s1606_s27 = scalar_lea.hbm %s2064_s8, 2048 }
 0x3d5   :  { %p1607_p1 = scmp.ne.s32.totalorder %s2064_s8, %s1606_s27  ;;  %p1610_p2 = scmp.lt.u32.totalorder %s1606_s27, %s2064_s8 }
 0x3d7   :  { %p1612_p3 = pnand %p1610_p2, %p1607_p1 }
 0x3d9   :  { %1615 = shalt.err (!%p1612_p3)
}
 0x3da   :  { %1119 = dma.vmem_to_hbm [thread:$0]  %s1114_s24, 2048, %s2064_s8, [#allocation10], %s1648_s17, %s1648_s17, %s1649_s18   ;;  %v769_v52 = vadd.f32 %v1914_v36, %v768_v51  ;;  %v910_v53 = vadd.f32 %v909_v47, %v1928_v46  ;;  %v774_v17 = vadd.f32 %v1345_v49, %v1914_v36  ;;  %v1348_v55 = vpop.f32.mrb[22].mxu0 }
 0x3db   :  { %v778_v56 = vpop.f32.mrb[23].mxu0  ;;  %v784_v59 = vadd.f32 %v1348_v55, %v1914_v36 }
 0x3dc   :  { %v911_v54 = vadd.f32 %v910_v53, %v769_v52  ;;  %v779_v57 = vadd.f32 %v1914_v36, %v778_v56  ;;  %v1351_v63 = vpop.f32.mrb[24].mxu0 }
 0x3dd   :  { %v788_v0 = vpop.f32.mrb[25].mxu0  ;;  %v794_v2 = vadd.f32 %v1351_v63, %v1914_v36 }
 0x3de   :  { %v912_v58 = vadd.f32 %v911_v54, %v774_v17  ;;  %v789_v3 = vadd.f32 %v1914_v36, %v788_v0  ;;  %v1354_v5 = vpop.f32.mrb[26].mxu0 }
 0x3df   :  { %v798_v28 = vpop.f32.mrb[27].mxu0  ;;  %v901_v6 = vmul.f32 0.0, %v794_v2  ;;  %v804_v38 = vadd.f32 %v1354_v5, %v1914_v36 }
 0x3e0   :  { %v913_v61 = vadd.f32 %v912_v58, %v779_v57  ;;  %v900_v4 = vmul.f32 0.0, %v789_v3  ;;  %v799_v9 = vadd.f32 %v1914_v36, %v798_v28 }
 0x3e1   :  { %v1357_v11 = vpop.f32.mrb[28].mxu0  ;;  %v903_v13 = vmul.f32 0.0, %v804_v38 }
 0x3e2   :  { %v914_v1 = vadd.f32 %v913_v61, %v784_v59  ;;  %v902_v48 = vmul.f32 0.0, %v799_v9  ;;  %v808_v12 = vpop.f32.mrb[29].mxu0  ;;  %v814_v14 = vadd.f32 %v1357_v11, %v1914_v36 }
 0x3e3   :  { %v809_v62 = vadd.f32 %v1914_v36, %v808_v12 }
 0x3e4   :  { %v915_v7 = vadd.f32 %v914_v1, %v900_v4  ;;  %v905_v8 = vmul.f32 0.0, %v814_v14 }
 0x3e5   :  { %v904_v15 = vmul.f32 0.0, %v809_v62  ;;  %v1360_v18 = vpop.f32.mrb[30].mxu0 }
 0x3e6   :  { %v916_v50 = vadd.f32 %v915_v7, %v901_v6  ;;  %v818_v19 = vpop.f32.mrb[31].mxu0  ;;  %v824_v10 = vadd.f32 %v1360_v18, %v1914_v36 }
 0x3e7   :  { %v819_v22 = vadd.f32 %v1914_v36, %v818_v19 }
 0x3e8   :  { %v917_v60 = vadd.f32 %v916_v50, %v902_v48  ;;  %v907_v26 = vmul.f32 0.0, %v824_v10 }
 0x3e9   :  { %v906_v24 = vmul.f32 0.0, %v819_v22 }
 0x3ea   :  { %v918_v16 = vadd.f32 %v917_v60, %v903_v13 }
 0x3ec   :  { %v919_v20 = vadd.f32 %v918_v16, %v904_v15 }
 0x3ee   :  { %v920_v25 = vadd.f32 %v919_v20, %v905_v8 }
 0x3f0   :  { %v921_v21 = vadd.f32 %v920_v25, %v906_v24 }
 0x3f2   :  { %v922_v27 = vadd.f32 %v921_v21, %v907_v26 }
 0x3f4   :  { %v923_v23 = vrot.slane %v922_v27, 4 }
 0x3f6   :  { %v924_v29 = vadd.f32 %v923_v23, %v922_v27 }
 0x3f8   :  { %v925_v30 = vrot.slane %v924_v29, 2 }
 0x3fa   :  { %v926_v31 = vadd.f32 %v925_v30, %v924_v29 }
 0x3fc   :  { %v927_v32 = vrot.slane %v926_v31, 1 }
 0x3fe   :  { %v928_v33 = vadd.f32 %v927_v32, %v926_v31 }
 0x400   :  { %v929_v34 = vmul.f32 0.015625, %v928_v33 }
 0x402   :  { %v1960_v35 = vsub.f32 %v1920_v41, %v929_v34  ;;  %v1963_v37 = vsub.f32 %v1917_v39, %v929_v34  ;;  %v1966_v36 = vsub.f32 %v1925_v45, %v929_v34  ;;  %v1969_v40 = vsub.f32 %v1928_v46, %v929_v34 }
 0x403   :  { %v1971_v42 = vsub.f32 %v769_v52, %v929_v34  ;;  %v1973_v43 = vsub.f32 %v774_v17, %v929_v34  ;;  %v1975_v44 = vsub.f32 %v779_v57, %v929_v34  ;;  %v1977_v47 = vsub.f32 %v784_v59, %v929_v34 }
 0x404   :  { %v1979_v49 = vsub.f32 %v789_v3, %v929_v34  ;;  %v1981_v41 = vsub.f32 %v794_v2, %v929_v34  ;;  %v1983_v39 = vsub.f32 %v799_v9, %v929_v34  ;;  %v1985_v51 = vsub.f32 %v804_v38, %v929_v34 }
 0x405   :  { %v1987_v45 = vsub.f32 %v809_v62, %v929_v34  ;;  %v1989_v46 = vsub.f32 %v814_v14, %v929_v34  ;;  %v1991_v52 = vsub.f32 %v819_v22, %v929_v34  ;;  %v1993_v53 = vsub.f32 %v824_v10, %v929_v34 }
 0x406   :  { %v962_v17 = vmul.f32 %v1960_v35, %v1960_v35  ;;  %v963_v54 = vmul.f32 %v1963_v37, %v1963_v37  ;;  %v964_v55 = vmul.f32 %v1966_v36, %v1966_v36  ;;  %v965_v57 = vmul.f32 %v1969_v40, %v1969_v40 }
 0x407   :  { %v966_v59 = vmul.f32 %v1971_v42, %v1971_v42  ;;  %v967_v63 = vmul.f32 %v1973_v43, %v1973_v43  ;;  %v954_v1 = vmul.f32 0.0, %v1979_v49  ;;  %v968_v2 = vmul.f32 %v1975_v44, %v1975_v44 }
 0x408   :  { %v978_v56 = vadd.f32 %v963_v54, %v962_v17  ;;  %v955_v4 = vmul.f32 0.0, %v1981_v41  ;;  %v969_v5 = vmul.f32 %v1977_v47, %v1977_v47  ;;  %v956_v6 = vmul.f32 0.0, %v1983_v39 }
 0x409   :  { %v970_v7 = vmul.f32 %v954_v1, %v954_v1  ;;  %v957_v9 = vmul.f32 0.0, %v1985_v51  ;;  %v958_v11 = vmul.f32 0.0, %v1987_v45  ;;  %v959_v60 = vmul.f32 0.0, %v1989_v46 }
 0x40a   :  { %v979_v58 = vadd.f32 %v978_v56, %v964_v55  ;;  %v971_v48 = vmul.f32 %v955_v4, %v955_v4  ;;  %v972_v12 = vmul.f32 %v956_v6, %v956_v6  ;;  %v960_v15 = vmul.f32 0.0, %v1991_v52 }
 0x40b   :  { %v973_v14 = vmul.f32 %v957_v9, %v957_v9  ;;  %v974_v16 = vmul.f32 %v958_v11, %v958_v11  ;;  %v961_v19 = vmul.f32 0.0, %v1993_v53  ;;  %v975_v8 = vmul.f32 %v959_v60, %v959_v60 }
 0x40c   :  { %v980_v61 = vadd.f32 %v979_v58, %v965_v57  ;;  %v976_v10 = vmul.f32 %v960_v15, %v960_v15 }
 0x40d   :  { %v977_v24 = vmul.f32 %v961_v19, %v961_v19 }
 0x40e   :  { %v981_v0 = vadd.f32 %v980_v61, %v966_v59 }
 0x410   :  { %v982_v3 = vadd.f32 %v981_v0, %v967_v63  ;;  %v1131_v63 = vld [vmem:[%s2061_s5] ss:$0 sm:$0xff] }
 0x412   :  { %v983_v28 = vadd.f32 %v982_v3, %v968_v2 }
 0x414   :  { %v984_v38 = vadd.f32 %v983_v28, %v969_v5 }
 0x416   :  { %v985_v50 = vadd.f32 %v984_v38, %v970_v7 }
 0x418   :  { %v986_v13 = vadd.f32 %v985_v50, %v971_v48 }
 0x41a   :  { %v987_v62 = vadd.f32 %v986_v13, %v972_v12 }
 0x41c   :  { %v988_v18 = vadd.f32 %v987_v62, %v973_v14 }
 0x41e   :  { %v989_v20 = vadd.f32 %v988_v18, %v974_v16 }
 0x420   :  { %v990_v22 = vadd.f32 %v989_v20, %v975_v8 }
 0x422   :  { %v991_v25 = vadd.f32 %v990_v22, %v976_v10 }
 0x424   :  { %v992_v26 = vadd.f32 %v991_v25, %v977_v24 }
 0x426   :  { %v993_v21 = vrot.slane %v992_v26, 4 }
 0x428   :  { %v994_v27 = vadd.f32 %v993_v21, %v992_v26 }
 0x42a   :  { %v995_v23 = vrot.slane %v994_v27, 2 }
 0x42c   :  { %v996_v29 = vadd.f32 %v995_v23, %v994_v27 }
 0x42e   :  { %v997_v30 = vrot.slane %v996_v29, 1 }
 0x430   :  { %v998_v31 = vadd.f32 %v997_v30, %v996_v29 }
 0x432   :  { %v999_v32 = vmul.f32 0.015625, %v998_v31 }
 0x434   :  { %v1000_v33 = vadd.f32 1e-05, %v999_v32 }
 0x436   :  { %1526 = vrsqrt.f32 %v1000_v33 }
 0x440   :  { %v1527_v34 = vpop.eup %1526 }
 0x441   :  { %v1002_v17 = vmul.f32 %v1527_v34, %v1960_v35  ;;  %v1003_v54 = vmul.f32 %v1527_v34, %v1963_v37  ;;  %v1004_v55 = vmul.f32 %v1527_v34, %v1966_v36  ;;  %v1005_v56 = vmul.f32 %v1527_v34, %v1969_v40 }
 0x442   :  { %v1006_v57 = vmul.f32 %v1527_v34, %v1971_v42  ;;  %v1007_v58 = vmul.f32 %v1527_v34, %v1973_v43  ;;  %v1008_v59 = vmul.f32 %v1527_v34, %v1975_v44  ;;  %v1009_v61 = vmul.f32 %v1527_v34, %v1977_v47 }
 0x443   :  { %v1010_v35 = vmul.f32 %v1527_v34, %v1979_v49  ;;  %v1011_v37 = vmul.f32 %v1527_v34, %v1981_v41  ;;  %v1012_v36 = vmul.f32 %v1527_v34, %v1983_v39  ;;  %v1013_v40 = vmul.f32 %v1527_v34, %v1985_v51  ;;  %v1132_v39 = vld [vmem:[%s2062_s6] ss:$0 sm:$0xff]  ;;  %s1656_s6 = smov [#allocation8]  }
 0x444   :  { %v1014_v42 = vmul.f32 %v1527_v34, %v1987_v45  ;;  %v1015_v43 = vmul.f32 %v1527_v34, %v1989_v46  ;;  %v1016_v44 = vmul.f32 %v1527_v34, %v1991_v52  ;;  %v1017_v47 = vmul.f32 %v1527_v34, %v1993_v53  ;;  %s1101_s14 = sshll.u32 %s1656_s6, 4  ;;  %s1102_s14 = int_to_ptr.vmem [resolvable:$true] %s1101_s14 }
 0x445   :  { %v1025_v0 = vmul.f32 %v1131_v63, %v1002_v17  ;;  %v1026_v1 = vmul.f32 %v1131_v63, %v1003_v54  ;;  %v1027_v2 = vmul.f32 %v1131_v63, %v1004_v55  ;;  %v1028_v3 = vmul.f32 %v1131_v63, %v1005_v56  ;;  %s1616_s15 = scalar_lea.vmem %s1102_s14, 2048  ;;  %p1621_p5 = scmp.lt.s32.totalorder %s1102_s14, %s1102_s14 }
 0x446   :  { %v1029_v4 = vmul.f32 %v1131_v63, %v1006_v57  ;;  %v1030_v49 = vmul.f32 %v1131_v63, %v1007_v58  ;;  %v1031_v5 = vmul.f32 %v1131_v63, %v1008_v59  ;;  %v1032_v41 = vmul.f32 %v1131_v63, %v1009_v61  ;;  %p1617_p4 = scmp.ne.s32.totalorder %s1102_s14, %s1616_s15  ;;  %p1622_p6 = scmp.lt.s32.totalorder %s1616_s15, %s1616_s15 }
 0x447   :  { %v1033_v51 = vmul.f32 %v1131_v63, %v1010_v35  ;;  %v1034_v45 = vmul.f32 %v1131_v63, %v1011_v37  ;;  %v1035_v28 = vmul.f32 %v1131_v63, %v1012_v36  ;;  %v1036_v46 = vmul.f32 %v1131_v63, %v1013_v40 }
 0x448   :  { %v1037_v6 = vmul.f32 %v1131_v63, %v1014_v42  ;;  %v1038_v52 = vmul.f32 %v1131_v63, %v1015_v43  ;;  %v1039_v7 = vmul.f32 %v1131_v63, %v1016_v44  ;;  %v1040_v53 = vmul.f32 %v1131_v63, %v1017_v47  ;;  %p1623_p7 = por %p1622_p6, %p1621_p5 }
 0x449   :  { %v1048_v38 = vadd.f32 %v1132_v39, %v1025_v0  ;;  %v1049_v9 = vadd.f32 %v1132_v39, %v1026_v1  ;;  %v1050_v48 = vadd.f32 %v1132_v39, %v1027_v2  ;;  %v1051_v50 = vadd.f32 %v1132_v39, %v1028_v3 }
 0x44a   :  { %v1052_v11 = vadd.f32 %v1132_v39, %v1029_v4  ;;  %v1053_v12 = vadd.f32 %v1132_v39, %v1030_v49  ;;  %v1054_v13 = vadd.f32 %v1132_v39, %v1031_v5  ;;  %v1055_v60 = vadd.f32 %v1132_v39, %v1032_v41  ;;  %p1624_p8 = pnand %p1623_p7, %p1617_p4 }
 0x44b   :  { %v1056_v14 = vadd.f32 %v1132_v39, %v1033_v51  ;;  %v1057_v62 = vadd.f32 %v1132_v39, %v1034_v45  ;;  %v1058_v15 = vadd.f32 %v1132_v39, %v1035_v28  ;;  %v1059_v16 = vadd.f32 %v1132_v39, %v1036_v46 }
 0x44c   :  { %v1060_v18 = vadd.f32 %v1132_v39, %v1037_v6  ;;  %v1061_v19 = vadd.f32 %v1132_v39, %v1038_v52  ;;  %v1062_v8 = vadd.f32 %v1132_v39, %v1039_v7  ;;  %v1063_v20 = vadd.f32 %v1132_v39, %v1040_v53 }
 0x44d   :  { %v1064_v10 = vmax.f32 %v1048_v38, 0.0  ;;  %v1065_v22 = vmax.f32 %v1049_v9, 0.0  ;;  %v1066_v24 = vmax.f32 %v1050_v48, 0.0  ;;  %v1067_v25 = vmax.f32 %v1051_v50, 0.0 }
 0x44e   :  { %v1068_v26 = vmax.f32 %v1052_v11, 0.0  ;;  %v1069_v21 = vmax.f32 %v1053_v12, 0.0  ;;  %v1070_v27 = vmax.f32 %v1054_v13, 0.0  ;;  %v1071_v23 = vmax.f32 %v1055_v60, 0.0 }
 0x44f   :  { %v1072_v29 = vmax.f32 %v1056_v14, 0.0  ;;  %v1073_v30 = vmax.f32 %v1057_v62, 0.0  ;;  %v1074_v31 = vmax.f32 %v1058_v15, 0.0  ;;  %v1075_v32 = vmax.f32 %v1059_v16, 0.0  ;;  %1080 = vst [vmem:[#allocation8] sm:$0xff] %v1064_v10  ;;  %1081 = vst [vmem:[#allocation8 + $0x8] sm:$0xff] %v1065_v22 }
 0x450   :  { %1082 = vst [vmem:[#allocation8 + $0x10] sm:$0xff] %v1066_v24  ;;  %1083 = vst [vmem:[#allocation8 + $0x18] sm:$0xff] %v1067_v25  ;;  %v1076_v33 = vmax.f32 %v1060_v18, 0.0  ;;  %v1077_v34 = vmax.f32 %v1061_v19, 0.0  ;;  %v1078_v17 = vmax.f32 %v1062_v8, 0.0  ;;  %v1079_v54 = vmax.f32 %v1063_v20, 0.0 }
 0x451   :  { %1084 = vst [vmem:[#allocation8 + $0x20] sm:$0xff] %v1068_v26  ;;  %1085 = vst [vmem:[#allocation8 + $0x28] sm:$0xff] %v1069_v21 }
 0x452   :  { %1086 = vst [vmem:[#allocation8 + $0x30] sm:$0xff] %v1070_v27  ;;  %1087 = vst [vmem:[#allocation8 + $0x38] sm:$0xff] %v1071_v23 }
 0x453   :  { %1088 = vst [vmem:[#allocation8 + $0x40] sm:$0xff] %v1072_v29  ;;  %1089 = vst [vmem:[#allocation8 + $0x48] sm:$0xff] %v1073_v30 }
 0x454   :  { %1090 = vst [vmem:[#allocation8 + $0x50] sm:$0xff] %v1074_v31  ;;  %1091 = vst [vmem:[#allocation8 + $0x58] sm:$0xff] %v1075_v32 }
 0x455   :  { %1092 = vst [vmem:[#allocation8 + $0x60] sm:$0xff] %v1076_v33  ;;  %1093 = vst [vmem:[#allocation8 + $0x68] sm:$0xff] %v1077_v34 }
 0x456   :  { %1094 = vst [vmem:[#allocation8 + $0x70] sm:$0xff] %v1078_v17  ;;  %1095 = vst [vmem:[#allocation8 + $0x78] sm:$0xff] %v1079_v54 }
 0x457   :  { %1627 = shalt.err (!%p1624_p8)
}
 0x458   :  { %s1628_s20 = scalar_lea.hbm %s2063_s7, 2048 }
 0x459   :  { %p1629_p9 = scmp.ne.s32.totalorder %s2063_s7, %s1628_s20  ;;  %p1632_p10 = scmp.lt.u32.totalorder %s1628_s20, %s2063_s7 }
 0x45b   :  { %p1634_p11 = pnand %p1632_p10, %p1629_p9 }
 0x45d   :  { %1637 = shalt.err (!%p1634_p11)
}
 0x45e   :  { %1107 = dma.vmem_to_hbm [thread:$0]  %s1102_s14, 2048, %s2063_s7, [#allocation4], %s1648_s17, %s1648_s17, %s1649_s18  }
 0x45f   :  { %1642 = dma.done.wait [#allocation4], 2048  }
 0x460   :  { %1643 = vsyncadd [#allocation4], 4294965248 }
 0x461   :  { %1644 = dma.done.wait [#allocation10], 2048  }
 0x462   :  { %1645 = vsyncadd [#allocation10], 4294965248 }
 0x463   :  { %1126 = vsyncpa [#allocation3], 1 }
 0x464   :  { %1127 = vsyncpa [#allocation6], 1 }
 0x465   :  { %1128 = vsyncpa [#allocation4], 1 }
 0x466   :  { %1129 = vsyncpa [#allocation10], 1 }

</bundles_post_ra>
